<compile_context>
chip_gen: v7x
topology: tpu7x:2x2x1
jax: 0.10.0
libtpu: 0.0.40
codegen_flags: <defaults>
</compile_context>

<pallas_src>
import math
import functools

import jax
import jax.numpy as jnp
from jax import lax
from jax.experimental import pallas as pl
from jax.experimental.pallas import tpu as pltpu

_LANES = 128
_MIB = 1024 * 1024


# ---------------------------------------------------------------------------
# Hardware-aware helpers
# ---------------------------------------------------------------------------
def _vmem_budget_bytes():
    """Generation-aware VMEM limit: ~48 MiB on 128 MiB parts, ~40 MiB on 64 MiB parts."""
    cap = 128 * _MIB
    try:
        cap = pltpu.get_tpu_info().vmem_capacity_bytes
    except Exception:
        pass
    return int(min(48 * _MIB, cap * 5 // 8))


def _has_bf16_eup():
    """True on generations with a bf16 EUP path (v6e / v7x); False on v5e and older."""
    try:
        kind = jax.devices()[0].device_kind.lower()
    except Exception:
        return False
    return not any(tag in kind for tag in ("v2", "v3", "v4", "v5"))


def _pick_tile(n, target):
    """Largest 8-aligned divisor of n that is <= target; whole axis if n <= target."""
    if n <= target:
        return n
    start = target - (target % 8)
    for t in range(start, 7, -8):
        if n % t == 0:
            return t
    # No 8-aligned divisor <= target. Using the whole axis stays correct; only allow
    # it while it is still reasonably small, otherwise fail loudly (don't blow VMEM).
    if n <= 4 * target:
        return n
    raise ValueError(
        f"cannot find an 8-aligned tile <= {target} for an axis of size {n}; "
        "pad the batch/sequence so B*T and T have an 8-aligned divisor")


def _maybe_resident_spec(block_shape, index_map, single_buffer):
    """BlockSpec for operands whose index_map is constant over the grid.

    With single_buffer=True the block is kept in one VMEM buffer
    (pipeline_mode=pl.Buffered(1)) instead of being double-buffered.
    """
    if single_buffer:
        return pl.BlockSpec(block_shape, index_map, pipeline_mode=pl.Buffered(1))
    return pl.BlockSpec(block_shape, index_map)


# ---------------------------------------------------------------------------
# Kernel 1: fused QKV projection (rows of x flattened to (B*T, C))
# ---------------------------------------------------------------------------
def _qkv_proj_kernel(x_ref, w_ref, b_ref, q_ref, k_ref, v_ref, *, n_embd):
    x = x_ref[...]                                                      # (tm, C)  bf16
    qkv = jnp.dot(x, w_ref[...], preferred_element_type=jnp.float32) + b_ref[...]
    C = n_embd
    q_ref[...] = qkv[:, 0:C].astype(q_ref.dtype)          # already scaled via W_q
    k_ref[...] = qkv[:, C:2 * C].astype(k_ref.dtype)
    v_ref[...] = qkv[:, 2 * C:3 * C].astype(v_ref.dtype)


# ---------------------------------------------------------------------------
# Kernel 2: flash attention (online softmax) + fused output projection
# ---------------------------------------------------------------------------
def _flash_attn_kernel(q_ref, k_ref, v_ref, wp_ref, bp_ref, o_ref,
                       m_scr, l_scr, acc_scr, *, n_head, head_dim, exp_in_bf16):
    qi = pl.program_id(1)
    ki = pl.program_id(2)
    nk = pl.num_programs(2)

    tq = q_ref.shape[1]
    tk = k_ref.shape[1]
    D = head_dim
    q_start = qi * tq
    k_start = ki * tk

    @pl.when(ki == 0)
    def _init():
        m_scr[...] = jnp.full(m_scr.shape, -jnp.inf, jnp.float32)
        l_scr[...] = jnp.zeros(l_scr.shape, jnp.float32)
        acc_scr[...] = jnp.zeros(acc_scr.shape, jnp.float32)

    def _lane_rep(x, width):
        # x: (tq, 128) lane-replicated value -> same value at lane-width `width`.
        if width == _LANES:
            return x
        if width < _LANES:
            return x[:, :width]
        if width % _LANES == 0:
            return jnp.tile(x, (1, width // _LANES))
        return x[:, :1]                       # broadcast fallback

    def _attend(apply_mask):
        q = q_ref[0]      # (tq, C) bf16 (1/sqrt(D) already folded into W_q)
        k = k_ref[0]      # (tk, C) bf16
        v = v_ref[0]      # (tk, C) bf16

        if apply_mask:    # only diagonal-crossing tiles pay for the mask
            row = lax.broadcasted_iota(jnp.int32, (tq, tk), 0) + q_start
            col = lax.broadcasted_iota(jnp.int32, (tq, tk), 1) + k_start
            causal = row >= col
            neg = jnp.float32(-10000000000.0)

        for h in range(n_head):   # static unroll; column slices, no (T,H,D) transpose
            sl = slice(h * D, (h + 1) * D)
            qh, kh, vh = q[:, sl], k[:, sl], v[:, sl]

            # scores: q_h @ k_h^T (fp32 accumulation on the MXU)
            s = lax.dot_general(qh, kh, (((1,), (1,)), ((), ())),
                                preferred_element_type=jnp.float32)        # (tq, tk)
            if apply_mask:
                s = jnp.where(causal, s, neg)                              # mask in fp32

            m_prev = m_scr[h]                                              # (tq, 128) replicated
            s_max = jnp.max(s, axis=-1, keepdims=True)                     # (tq, 1)
            m_next = jnp.maximum(m_prev, s_max)                            # (tq, 128)
            alpha = jnp.exp(m_prev - m_next)                               # (tq, 128) f32

            s_shift = s - _lane_rep(m_next, tk)
            if exp_in_bf16:
                # bf16 EUP path (v6e / v7x): p already bf16 for the PV matmul.
                p = jnp.exp(s_shift.astype(jnp.bfloat16))                  # (tq, tk) bf16
                p_sum = jnp.sum(p.astype(jnp.float32), axis=-1, keepdims=True)
                p_mm = p
            else:
                # v5e and older: keep exp in fp32 (no bf16 EUP).
                p = jnp.exp(s_shift)                                       # (tq, tk) f32
                p_sum = jnp.sum(p, axis=-1, keepdims=True)
                p_mm = p.astype(v.dtype)

            l_scr[h] = alpha * l_scr[h] + p_sum
            m_scr[h] = m_next

            pv = lax.dot_general(p_mm, vh, (((1,), (0,)), ((), ())),
                                 preferred_element_type=jnp.float32)       # (tq, D)
            acc_scr[:, sl] = _lane_rep(alpha, D) * acc_scr[:, sl] + pv
        # TODO(synk): attn_drop is identity here (eval mode, dropout=0.0).

    not_future = k_start <= q_start + tq - 1       # tile has at least one visible key
    fully_past = k_start + tk <= q_start + 1       # tile entirely below the diagonal

    @pl.when(jnp.logical_and(not_future, fully_past))
    def _unmasked():
        _attend(apply_mask=False)

    @pl.when(jnp.logical_and(not_future, jnp.logical_not(fully_past)))
    def _masked():
        _attend(apply_mask=True)

    @pl.when(ki == nk - 1)
    def _finalize():
        for h in range(n_head):
            sl = slice(h * D, (h + 1) * D)
            inv_l = pl.reciprocal(l_scr[h], approx=True)                   # EUP, ~free
            acc_scr[:, sl] = acc_scr[:, sl] * _lane_rep(inv_l, D)
        y = acc_scr[...].astype(jnp.bfloat16)                              # (tq, C) dense read
        out = jnp.dot(y, wp_ref[...], preferred_element_type=jnp.float32) + bp_ref[...]
        # TODO(synk): resid_drop is identity here (eval mode, dropout=0.0).
        o_ref[0] = out.astype(o_ref.dtype)


# ---------------------------------------------------------------------------
# Wrapper
# ---------------------------------------------------------------------------
def _forward(x, w_qkv, b_qkv, wp, bp, n_head, *, q_tile, kv_tile, row_tile,
             out_dtype, single_buffer_weights):
    B, T, C = x.shape
    D = C // n_head
    vmem_limit = _vmem_budget_bytes()
    exp_in_bf16 = _has_bf16_eup()

    # ---------------- kernel 1: fused QKV projection ----------------
    BT = B * T
    tm = _pick_tile(BT, row_tile)
    x2 = x.reshape(BT, C).astype(jnp.bfloat16)

    q2, k2, v2 = pl.pallas_call(
        functools.partial(_qkv_proj_kernel, n_embd=C),
        out_shape=tuple(jax.ShapeDtypeStruct((BT, C), jnp.bfloat16) for _ in range(3)),
        grid_spec=pltpu.PrefetchScalarGridSpec(
            num_scalar_prefetch=0,
            grid=(BT // tm,),
            in_specs=[
                pl.BlockSpec((tm, C), lambda i: (i, 0)),                       # x rows
                _maybe_resident_spec((C, 3 * C), lambda i: (0, 0),
                                     single_buffer_weights),                   # fused W_qkv
                _maybe_resident_spec((1, 3 * C), lambda i: (0, 0),
                                     single_buffer_weights),                   # fused bias
            ],
            out_specs=[pl.BlockSpec((tm, C), lambda i: (i, 0)) for _ in range(3)],
        ),
        compiler_params=pltpu.CompilerParams(
            dimension_semantics=("parallel",),
            vmem_limit_bytes=vmem_limit),
    )(x2, w_qkv, b_qkv)

    q3 = q2.reshape(B, T, C)
    k3 = k2.reshape(B, T, C)
    v3 = v2.reshape(B, T, C)

    # ---------------- kernel 2: flash attention + output projection ----------------
    tq = _pick_tile(T, q_tile)
    tk = _pick_tile(T, kv_tile)

    # K/V index maps clamp the kv block index to the last tile this q tile can see,
    # so causally-skipped (future) kv tiles never issue fresh HBM DMAs (the compute
    # for them is skipped by the pl.when inside the kernel).
    def _kv_index(b, qi, ki):
        last_needed = ((qi + 1) * tq - 1) // tk
        return (b, jnp.minimum(ki, last_needed), 0)

    out = pl.pallas_call(
        functools.partial(_flash_attn_kernel, n_head=n_head, head_dim=D,
                          exp_in_bf16=exp_in_bf16),
        out_shape=jax.ShapeDtypeStruct((B, T, C), out_dtype),
        grid_spec=pltpu.PrefetchScalarGridSpec(
            num_scalar_prefetch=0,
            grid=(B, T // tq, T // tk),
            in_specs=[
                pl.BlockSpec((1, tq, C), lambda b, qi, ki: (b, qi, 0)),        # q
                pl.BlockSpec((1, tk, C), _kv_index),                           # k (clamped)
                pl.BlockSpec((1, tk, C), _kv_index),                           # v (clamped)
                _maybe_resident_spec((C, C), lambda b, qi, ki: (0, 0),
                                     single_buffer_weights),                   # W_proj
                _maybe_resident_spec((1, C), lambda b, qi, ki: (0, 0),
                                     single_buffer_weights),                   # b_proj
            ],
            out_specs=pl.BlockSpec((1, tq, C), lambda b, qi, ki: (b, qi, 0)),
            scratch_shapes=[
                pltpu.VMEM((n_head, tq, _LANES), jnp.float32),   # running max (lane-replicated)
                pltpu.VMEM((n_head, tq, _LANES), jnp.float32),   # running denom (lane-replicated)
                pltpu.VMEM((tq, C), jnp.float32),                # lane-dense output accumulator
            ],
        ),
        compiler_params=pltpu.CompilerParams(
            dimension_semantics=("parallel", "parallel", "arbitrary"),
            vmem_limit_bytes=vmem_limit),
    )(q3, k3, v3, wp, bp)

    return out


def causal_self_attention(x, params, n_head, *, q_tile=None, kv_tile=256,
                          row_tile=256, out_dtype=None):
    """x: (B, T, C) float32.  params: dict of PyTorch-convention weights/biases."""
    B, T, C = x.shape
    assert C % n_head == 0
    D = C // n_head
    q_scale = 1.0 / math.sqrt(D)
    out_dtype = x.dtype if out_dtype is None else out_dtype

    if q_tile is None:
        # 128 MiB-VMEM parts (v5e/v6e) afford a taller q tile (halves K/V re-reads);
        # stay at 256 on 64 MiB parts (v7x).
        q_tile = 512 if _vmem_budget_bytes() >= 44 * _MIB else 256

    # Pack weights once (PyTorch (out,in) -> (in,out), bf16 for the MXU). The
    # 1/sqrt(head_dim) scale is folded into W_q / b_q, so q is scaled before the
    # bf16 round and no per-tile multiply is needed in the kernels.
    w_qkv = jnp.concatenate(
        [params['wq'].T * q_scale, params['wk'].T, params['wv'].T], axis=1
    ).astype(jnp.bfloat16)                                                 # (C, 3C)
    b_qkv = jnp.concatenate(
        [params['bq'] * q_scale, params['bk'], params['bv']], axis=0
    ).reshape(1, 3 * C).astype(jnp.float32)                                # (1, 3C)
    wp = params['wp'].T.astype(jnp.bfloat16)                               # (C, C)
    bp = params['bp'].reshape(1, C).astype(jnp.float32)                    # (1, C)

    kwargs = dict(q_tile=q_tile, kv_tile=kv_tile, row_tile=row_tile, out_dtype=out_dtype)
    try:
        return _forward(x, w_qkv, b_qkv, wp, bp, n_head,
                        single_buffer_weights=True, **kwargs)
    except Exception:
        # pl.Buffered(1) not supported on this jax version/backend: fall back to the
        # default double-buffered resident weights (correct, just more VMEM).
        return _forward(x, w_qkv, b_qkv, wp, bp, n_head,
                        single_buffer_weights=False, **kwargs)


# ---------------------------------------------------------------------------
# Pure-JAX reference mirroring the PyTorch forward (fp32)
# ---------------------------------------------------------------------------
def _reference(x, params, n_head):
    B, T, C = x.shape
    D = C // n_head

    def lin(x, w, b):  # PyTorch Linear: x @ W^T + b
        return jnp.einsum('btc,oc->bto', x, w) + b

    q = lin(x, params['wq'], params['bq']).reshape(B, T, n_head, D).transpose(0, 2, 1, 3)
    k = lin(x, params['wk'], params['bk']).reshape(B, T, n_head, D).transpose(0, 2, 1, 3)
    v = lin(x, params['wv'], params['bv']).reshape(B, T, n_head, D).transpose(0, 2, 1, 3)

    att = jnp.einsum('bhtd,bhsd->bhts', q, k) * (1.0 / math.sqrt(D))
    mask = jnp.tril(jnp.ones((T, T)))[None, None]
    att = jnp.where(mask == 0, -10000000000.0, att)
    att = jax.nn.softmax(att, axis=-1)
    y = jnp.einsum('bhts,bhsd->bhtd', att, v)
    y = y.transpose(0, 2, 1, 3).reshape(B, T, C)
    return lin(y, params['wp'], params['bp'])


if __name__ == "__main__":
    # Small config consistent with the module: B=2, T=8 (block_size>=T), C=32, n_head=4.
    B, T, C, n_head = 2, 8, 32, 4

    key = jax.random.PRNGKey(0)
    keys = jax.random.split(key, 10)
    scale = 0.02

    params = {
        'wq': scale * jax.random.normal(keys[0], (C, C), jnp.float32),
        'bq': scale * jax.random.normal(keys[1], (C,), jnp.float32),
        'wk': scale * jax.random.normal(keys[2], (C, C), jnp.float32),
        'bk': scale * jax.random.normal(keys[3], (C,), jnp.float32),
        'wv': scale * jax.random.normal(keys[4], (C, C), jnp.float32),
        'bv': scale * jax.random.normal(keys[5], (C,), jnp.float32),
        'wp': scale * jax.random.normal(keys[6], (C, C), jnp.float32),
        'bp': scale * jax.random.normal(keys[7], (C,), jnp.float32),
    }
    x = jax.random.normal(keys[8], (B, T, C), jnp.float32)

    out = causal_self_attention(x, params, n_head)
    out = jax.block_until_ready(out)

    ref = _reference(x, params, n_head)
    assert out.shape == (B, T, C)
    # bf16 matmul operands (+ bf16 exp on v6e/v7x) + approx reciprocal => loosened
    # tolerance vs the fp32 reference.
    assert jnp.allclose(out, ref, atol=2e-3, rtol=2e-2), "mismatch vs reference"

    print("KERNEL_OK")
</pallas_src>

<mosaic_0001>
module attributes {stable_mosaic.version = 11 : i64} {
  func.func @_qkv_proj_kernel(%arg0: i32, %arg1: memref<16x32xbf16, #tpu.memory_space<vmem>>, %arg2: memref<32x96xbf16, #tpu.memory_space<vmem>>, %arg3: memref<1x96xf32, #tpu.memory_space<vmem>>, %arg4: memref<16x32xbf16, #tpu.memory_space<vmem>>, %arg5: memref<16x32xbf16, #tpu.memory_space<vmem>>, %arg6: memref<16x32xbf16, #tpu.memory_space<vmem>>) attributes {dimension_semantics = [#tpu.dimension_semantics<parallel>], iteration_bounds = array<i64: 1>, scalar_prefetch = 0 : i64, scratch_operands = 0 : i64, tpu.core_type = #tpu.core_type<tc>, window_params = [{transform_indices = @transform_0, window_bounds = array<i64: 16, 32>}, {pipeline_mode = #tpu.pipeline_mode<synchronous>, transform_indices = @transform_1, window_bounds = array<i64: 32, 96>}, {pipeline_mode = #tpu.pipeline_mode<synchronous>, transform_indices = @transform_2, window_bounds = array<i64: 1, 96>}, {transform_indices = @transform_3, window_bounds = array<i64: 16, 32>}, {transform_indices = @transform_4, window_bounds = array<i64: 16, 32>}, {transform_indices = @transform_5, window_bounds = array<i64: 16, 32>}]} {
    %c0 = arith.constant 0 : index
    %c0_0 = arith.constant 0 : index
    %0 = vector.load %arg1[%c0, %c0_0] : memref<16x32xbf16, #tpu.memory_space<vmem>>, vector<16x32xbf16>
    %c0_1 = arith.constant 0 : index
    %c0_2 = arith.constant 0 : index
    %1 = vector.load %arg2[%c0_1, %c0_2] : memref<32x96xbf16, #tpu.memory_space<vmem>>, vector<32x96xbf16>
    %cst = arith.constant dense<0.000000e+00> : vector<16x96xf32>
    %2 = tpu.matmul %0, %1, %cst {dimension_numbers = #tpu.dot_dimension_numbers<[1], [0], [0], [1], [0, 0, 1, 1], [], []>} : vector<16x32xbf16>, vector<32x96xbf16>, vector<16x96xf32> -> vector<16x96xf32>
    %c0_3 = arith.constant 0 : index
    %c0_4 = arith.constant 0 : index
    %3 = vector.load %arg3[%c0_3, %c0_4] : memref<1x96xf32, #tpu.memory_space<vmem>>, vector<1x96xf32>
    %4 = vector.broadcast %3 : vector<1x96xf32> to vector<16x96xf32>
    %5 = arith.addf %2, %4 : vector<16x96xf32>
    %6 = vector.extract_strided_slice %5 {offsets = [0, 0], sizes = [16, 32], strides = [1, 1]} : vector<16x96xf32> to vector<16x32xf32>
    %7 = arith.truncf %6 : vector<16x32xf32> to vector<16x32xbf16>
    %c0_5 = arith.constant 0 : index
    %c0_6 = arith.constant 0 : index
    %8 = vector.load %arg4[%c0_5, %c0_6] : memref<16x32xbf16, #tpu.memory_space<vmem>>, vector<16x32xbf16>
    tpu.vector_store %arg4[%c0_5, %c0_6], %7 {strides = array<i32>} : memref<16x32xbf16, #tpu.memory_space<vmem>>, vector<16x32xbf16>,
    %9 = vector.extract_strided_slice %5 {offsets = [0, 32], sizes = [16, 32], strides = [1, 1]} : vector<16x96xf32> to vector<16x32xf32>
    %10 = arith.truncf %9 : vector<16x32xf32> to vector<16x32xbf16>
    %c0_7 = arith.constant 0 : index
    %c0_8 = arith.constant 0 : index
    %11 = vector.load %arg5[%c0_7, %c0_8] : memref<16x32xbf16, #tpu.memory_space<vmem>>, vector<16x32xbf16>
    tpu.vector_store %arg5[%c0_7, %c0_8], %10 {strides = array<i32>} : memref<16x32xbf16, #tpu.memory_space<vmem>>, vector<16x32xbf16>,
    %12 = vector.extract_strided_slice %5 {offsets = [0, 64], sizes = [16, 32], strides = [1, 1]} : vector<16x96xf32> to vector<16x32xf32>
    %13 = arith.truncf %12 : vector<16x32xf32> to vector<16x32xbf16>
    %c0_9 = arith.constant 0 : index
    %c0_10 = arith.constant 0 : index
    %14 = vector.load %arg6[%c0_9, %c0_10] : memref<16x32xbf16, #tpu.memory_space<vmem>>, vector<16x32xbf16>
    tpu.vector_store %arg6[%c0_9, %c0_10], %13 {strides = array<i32>} : memref<16x32xbf16, #tpu.memory_space<vmem>>, vector<16x32xbf16>,
    return
  }
  func.func @transform_0(%arg0: i32) -> (i32, i32) {
    %c0_i32 = arith.constant 0 : i32
    %c0_i32_0 = arith.constant 0 : i32
    return %arg0, %c0_i32 : i32, i32
  }
  func.func @transform_1(%arg0: i32) -> (i32, i32) {
    %c0_i32 = arith.constant 0 : i32
    %c0_i32_0 = arith.constant 0 : i32
    %c0_i32_1 = arith.constant 0 : i32
    return %c0_i32, %c0_i32_0 : i32, i32
  }
  func.func @transform_2(%arg0: i32) -> (i32, i32) {
    %c0_i32 = arith.constant 0 : i32
    %c0_i32_0 = arith.constant 0 : i32
    %c0_i32_1 = arith.constant 0 : i32
    return %c0_i32, %c0_i32_0 : i32, i32
  }
  func.func @transform_3(%arg0: i32) -> (i32, i32) {
    %c0_i32 = arith.constant 0 : i32
    %c0_i32_0 = arith.constant 0 : i32
    return %arg0, %c0_i32 : i32, i32
  }
  func.func @transform_4(%arg0: i32) -> (i32, i32) {
    %c0_i32 = arith.constant 0 : i32
    %c0_i32_0 = arith.constant 0 : i32
    return %arg0, %c0_i32 : i32, i32
  }
  func.func @transform_5(%arg0: i32) -> (i32, i32) {
    %c0_i32 = arith.constant 0 : i32
    %c0_i32_0 = arith.constant 0 : i32
    return %arg0, %c0_i32 : i32, i32
  }
}

module attributes {stable_mosaic.version = 11 : i64} {
  func.func @_qkv_proj_kernel(%arg0: i32, %arg1: memref<16x32xbf16, #tpu.memory_space<vmem>>, %arg2: memref<32x96xbf16, #tpu.memory_space<vmem>>, %arg3: memref<1x96xf32, #tpu.memory_space<vmem>>, %arg4: memref<16x32xbf16, #tpu.memory_space<vmem>>, %arg5: memref<16x32xbf16, #tpu.memory_space<vmem>>, %arg6: memref<16x32xbf16, #tpu.memory_space<vmem>>) attributes {dimension_semantics = [#tpu.dimension_semantics<parallel>], iteration_bounds = array<i64: 1>, scalar_prefetch = 0 : i64, scratch_operands = 0 : i64, tpu.core_type = #tpu.core_type<tc>, window_params = [{transform_indices = @transform_0, window_bounds = array<i64: 16, 32>}, {pipeline_mode = #tpu.pipeline_mode<synchronous>, transform_indices = @transform_1, window_bounds = array<i64: 32, 96>}, {pipeline_mode = #tpu.pipeline_mode<synchronous>, transform_indices = @transform_2, window_bounds = array<i64: 1, 96>}, {transform_indices = @transform_3, window_bounds = array<i64: 16, 32>}, {transform_indices = @transform_4, window_bounds = array<i64: 16, 32>}, {transform_indices = @transform_5, window_bounds = array<i64: 16, 32>}]} {
    %c0 = arith.constant 0 : index
    %c0_0 = arith.constant 0 : index
    %0 = vector.load %arg1[%c0, %c0_0] : memref<16x32xbf16, #tpu.memory_space<vmem>>, vector<16x32xbf16>
    %c0_1 = arith.constant 0 : index
    %c0_2 = arith.constant 0 : index
    %1 = vector.load %arg2[%c0_1, %c0_2] : memref<32x96xbf16, #tpu.memory_space<vmem>>, vector<32x96xbf16>
    %cst = arith.constant dense<0.000000e+00> : vector<16x96xf32>
    %2 = tpu.matmul %0, %1, %cst {dimension_numbers = #tpu.dot_dimension_numbers<[1], [0], [0], [1], [0, 0, 1, 1], [], []>} : vector<16x32xbf16>, vector<32x96xbf16>, vector<16x96xf32> -> vector<16x96xf32>
    %c0_3 = arith.constant 0 : index
    %c0_4 = arith.constant 0 : index
    %3 = vector.load %arg3[%c0_3, %c0_4] : memref<1x96xf32, #tpu.memory_space<vmem>>, vector<1x96xf32>
    %4 = vector.broadcast %3 : vector<1x96xf32> to vector<16x96xf32>
    %5 = arith.addf %2, %4 : vector<16x96xf32>
    %6 = vector.extract_strided_slice %5 {offsets = [0, 0], sizes = [16, 32], strides = [1, 1]} : vector<16x96xf32> to vector<16x32xf32>
    %7 = arith.truncf %6 : vector<16x32xf32> to vector<16x32xbf16>
    %c0_5 = arith.constant 0 : index
    %c0_6 = arith.constant 0 : index
    %8 = vector.load %arg4[%c0_5, %c0_6] : memref<16x32xbf16, #tpu.memory_space<vmem>>, vector<16x32xbf16>
    tpu.vector_store %arg4[%c0_5, %c0_6], %7 {strides = array<i32>} : memref<16x32xbf16, #tpu.memory_space<vmem>>, vector<16x32xbf16>,
    %9 = vector.extract_strided_slice %5 {offsets = [0, 32], sizes = [16, 32], strides = [1, 1]} : vector<16x96xf32> to vector<16x32xf32>
    %10 = arith.truncf %9 : vector<16x32xf32> to vector<16x32xbf16>
    %c0_7 = arith.constant 0 : index
    %c0_8 = arith.constant 0 : index
    %11 = vector.load %arg5[%c0_7, %c0_8] : memref<16x32xbf16, #tpu.memory_space<vmem>>, vector<16x32xbf16>
    tpu.vector_store %arg5[%c0_7, %c0_8], %10 {strides = array<i32>} : memref<16x32xbf16, #tpu.memory_space<vmem>>, vector<16x32xbf16>,
    %12 = vector.extract_strided_slice %5 {offsets = [0, 64], sizes = [16, 32], strides = [1, 1]} : vector<16x96xf32> to vector<16x32xf32>
    %13 = arith.truncf %12 : vector<16x32xf32> to vector<16x32xbf16>
    %c0_9 = arith.constant 0 : index
    %c0_10 = arith.constant 0 : index
    %14 = vector.load %arg6[%c0_9, %c0_10] : memref<16x32xbf16, #tpu.memory_space<vmem>>, vector<16x32xbf16>
    tpu.vector_store %arg6[%c0_9, %c0_10], %13 {strides = array<i32>} : memref<16x32xbf16, #tpu.memory_space<vmem>>, vector<16x32xbf16>,
    return
  }
  func.func @transform_0(%arg0: i32) -> (i32, i32) {
    %c0_i32 = arith.constant 0 : i32
    %c0_i32_0 = arith.constant 0 : i32
    return %arg0, %c0_i32 : i32, i32
  }
  func.func @transform_1(%arg0: i32) -> (i32, i32) {
    %c0_i32 = arith.constant 0 : i32
    %c0_i32_0 = arith.constant 0 : i32
    %c0_i32_1 = arith.constant 0 : i32
    return %c0_i32, %c0_i32_0 : i32, i32
  }
  func.func @transform_2(%arg0: i32) -> (i32, i32) {
    %c0_i32 = arith.constant 0 : i32
    %c0_i32_0 = arith.constant 0 : i32
    %c0_i32_1 = arith.constant 0 : i32
    return %c0_i32, %c0_i32_0 : i32, i32
  }
  func.func @transform_3(%arg0: i32) -> (i32, i32) {
    %c0_i32 = arith.constant 0 : i32
    %c0_i32_0 = arith.constant 0 : i32
    return %arg0, %c0_i32 : i32, i32
  }
  func.func @transform_4(%arg0: i32) -> (i32, i32) {
    %c0_i32 = arith.constant 0 : i32
    %c0_i32_0 = arith.constant 0 : i32
    return %arg0, %c0_i32 : i32, i32
  }
  func.func @transform_5(%arg0: i32) -> (i32, i32) {
    %c0_i32 = arith.constant 0 : i32
    %c0_i32_0 = arith.constant 0 : i32
    return %arg0, %c0_i32 : i32, i32
  }
}

</mosaic_0001>

<bundles_post_ra>
// kernel: tpu_custom_call.1
= control target key start
LH: loop header
LB: loop body
LE: loop exit
PB: predicated region body
PF: predicated region fallthrough
CT: control target
= control target key end

     0   :  { %11 = vsyncpa [#allocation3], 0  ;;  %s483_s0 = inlined_call_operand.hbm [shape: bf16[16,32], index: 0, kind: input, shape index: {}]   ;;  %s484_s1 = inlined_call_operand.hbm [shape: bf16[32,96], index: 1, kind: input, shape index: {}]   ;;  %s485_s2 = inlined_call_operand.vmem [shape: f32[1,96], index: 2, kind: input, shape index: {}]   ;;  %s486_s3 = inlined_call_operand.hbm [shape: bf16[16,32], index: 3, kind: output, shape index: {0}]   ;;  %s487_s4 = inlined_call_operand.hbm [shape: bf16[16,32], index: 4, kind: output, shape index: {1}]   ;;  %s488_s5 = inlined_call_operand.hbm [shape: bf16[16,32], index: 5, kind: output, shape index: {2}]  }
   0x1   :  { %12 = vsyncpa [#allocation6], 0 }
   0x2   :  { %13 = vsyncpa [#allocation4], 0 }
   0x3   :  { %14 = vsyncpa [#allocation9], 0  ;;  %s350_s18 = smov [#allocation2]   ;;  %s232_s22 = scalar_lea.hbm %s483_s0, 128 }
   0x4   :  { %s20_s19 = sshll.u32 %s350_s18, 4  ;;  %p233_p0 = scmp.ne.s32.totalorder %s483_s0, %s232_s22  ;;  %s21_s19 = int_to_ptr.vmem [resolvable:$true] %s20_s19 }
   0x5   :  { %p236_p1 = scmp.lt.u32.totalorder %s232_s22, %s483_s0 }
   0x7   :  { %p238_p2 = pnand %p236_p1, %p233_p0 }
   0x9   :  { %241 = shalt.err (!%p238_p2)
}
   0xa   :  { %s242_s27 = scalar_lea.vmem %s21_s19, 128  ;;  %p247_p4 = scmp.lt.s32.totalorder %s21_s19, %s21_s19 }
   0xb   :  { %p243_p3 = scmp.ne.s32.totalorder %s21_s19, %s242_s27  ;;  %p248_p5 = scmp.lt.s32.totalorder %s242_s27, %s242_s27 }
   0xd   :  { %p249_p6 = por %p248_p5, %p247_p4 }
   0xf   :  { %p250_p7 = pnand %p249_p6, %p243_p3 }
  0x11   :  { %253 = shalt.err (!%p250_p7)
}
  0x12   :  { %s351_s28 = smov 64   ;;  %s352_s29 = smov 4  }
  0x13   :  { %26 = dma.hbm_to_vmem [thread:$0]  %s483_s0, 128, %s21_s19, [#allocation3], %s351_s28, %s351_s28, %s352_s29  }
  0x14   :  { %s353_s7 = smov [#allocation5]   ;;  %s254_s11 = scalar_lea.hbm %s484_s1, 256 }
  0x15   :  { %s32_s8 = sshll.u32 %s353_s7, 4  ;;  %p255_p8 = scmp.ne.s32.totalorder %s484_s1, %s254_s11  ;;  %s33_s8 = int_to_ptr.vmem [resolvable:$true] %s32_s8 }
  0x16   :  { %p258_p9 = scmp.lt.u32.totalorder %s254_s11, %s484_s1 }
  0x18   :  { %p260_p10 = pnand %p258_p9, %p255_p8 }
  0x1a   :  { %263 = shalt.err (!%p260_p10)
}
  0x1b   :  { %s264_s16 = scalar_lea.vmem %s33_s8, 256  ;;  %p269_p12 = scmp.lt.s32.totalorder %s33_s8, %s33_s8 }
  0x1c   :  { %p265_p11 = scmp.ne.s32.totalorder %s33_s8, %s264_s16  ;;  %p270_p13 = scmp.lt.s32.totalorder %s264_s16, %s264_s16 }
  0x1e   :  { %p271_p0 = por %p270_p13, %p269_p12 }
  0x20   :  { %p272_p1 = pnand %p271_p0, %p265_p11 }
  0x22   :  { %275 = shalt.err (!%p272_p1)
}
  0x23   :  { %38 = dma.hbm_to_vmem [thread:$0]  %s484_s1, 256, %s33_s8, [#allocation6], %s351_s28, %s351_s28, %s352_s29  }
  0x24   :  { %342 = dma.done.wait [#allocation3], 128  }
  0x25   :  { %343 = vsyncadd [#allocation3], 4294967168 }
  0x26   :  { %344 = dma.done.wait [#allocation6], 256  }
  0x27   :  { %345 = vsyncadd [#allocation6], 4294967040  ;;  %v354_v0 = vmov 0.0   ;;  %vm355_vm0 = vmmov 0   ;;  %v229_v1 = vld [vmem:[#allocation5] sm:$0xff]   ;;  %v230_v2 = vld [vmem:[#allocation5 + $0x8] sm:$0xff]  }
  0x28   :  { %211 = vmatprep.subr.bf16.mxu0 %v354_v0  ;;  %215 = vmatprep.mubr.msk.bf16.mxu0 %vm355_vm0, %v354_v0  ;;  %v231_v3 = vld [vmem:[#allocation2] sm:$0xff]   ;;  %vm78_vm1 = vcmask 261120   ;;  %vm131_vm2 = vcmask 257024   ;;  %s356_s1 = smov [#allocation7]   ;;  %s357_s21 = smov 96  }
  0x29   :  { %212 = vmatpush3.bf16.msra.mxu0 %v229_v1  ;;  %v199_v4 = vld [vmem:[%s485_s2] ss:$0 sm:$0xff]  ;;  %s155_s20 = sshll.u32 %s356_s1, 4  ;;  %s156_s20 = int_to_ptr.vmem [resolvable:$true] %s155_s20 }
  0x2a   :  { %213 = vmatprep.subr.bf16.mxu0 %v354_v0  ;;  %s276_s2 = scalar_lea.vmem %s156_s20, 128  ;;  %p281_p3 = scmp.lt.s32.totalorder %s156_s20, %s156_s20 }
  0x2b   :  { %p277_p2 = scmp.ne.s32.totalorder %s156_s20, %s276_s2  ;;  %p282_p4 = scmp.lt.s32.totalorder %s276_s2, %s276_s2 }
  0x2d   :  { %214 = vmatpush3.bf16.msra.mxu0 %v230_v2  ;;  %p283_p5 = por %p282_p4, %p281_p3 }
  0x2f   :  { %p284_p6 = pnand %p283_p5, %p277_p2 }
  0x30   :  { %216 = vmatmul.mubr.msk.bf16.vlgmr.msra.gmra.mrb[0].mxu0 %vm78_vm1, %v231_v3 }
 0x103   :  { %v116_v5 = vpop.f32.mrb[0].mxu0 }
 0x104   :  { %v117_v6 = vadd.f32 %v199_v4, %v116_v5  ;;  %v217_v7 = vpop.f32.mrb[1].mxu0 }
 0x105   :  { %v119_v8 = vpop.f32.mrb[2].mxu0 }
 0x106   :  { %v206_v9 = vpack.c.bf16 %v117_v6, %v117_v6  ;;  %v120_v10 = vadd.f32 %v199_v4, %v119_v8  ;;  %v218_v11 = vpop.f32.mrb[3].mxu0 }
 0x108   :  { %v207_v12 = vpack.c.bf16 %v120_v10, %v120_v10  ;;  %142 = vrot.lane.b32.xlu1 %v206_v9, %s351_s28  ;;  %134 = vrot.lane.b32.xlu0 %v206_v9, %s357_s21  ;;  %132 = vst.msk [vmem:[#allocation7] sm:$0xf] %vm131_vm2, %v206_v9 }
 0x10a   :  { %133 = vst.msk [vmem:[#allocation7 + $0x4] sm:$0xf] %vm131_vm2, %v207_v12 }
 0x10b   :  { %287 = shalt.err (!%p284_p6)
}
 0x10c   :  { %s288_s24 = scalar_lea.hbm %s486_s3, 128 }
 0x10d   :  { %p289_p7 = scmp.ne.s32.totalorder %s486_s3, %s288_s24  ;;  %p292_p8 = scmp.lt.u32.totalorder %s288_s24, %s486_s3 }
 0x10f   :  { %p294_p9 = pnand %p292_p8, %p289_p7 }
 0x111   :  { %297 = shalt.err (!%p294_p9)
}
 0x112   :  { %161 = dma.vmem_to_hbm [thread:$0]  %s156_s20, 128, %s486_s3, [#allocation4], %s351_s28, %s351_s28, %s352_s29  }
 0x113   :  { %144 = vrot.lane.b32.xlu1 %v207_v12, %s351_s28  ;;  %136 = vrot.lane.b32.xlu0 %v207_v12, %s357_s21  ;;  %s358_s8 = smov [#allocation8]   ;;  %s359_s10 = smov [#allocation10]  }
 0x114   :  { %s167_s9 = sshll.u32 %s358_s8, 4  ;;  %s179_s11 = sshll.u32 %s359_s10, 4  ;;  %s168_s9 = int_to_ptr.vmem [resolvable:$true] %s167_s9  ;;  %s444_s11 = int_to_ptr.vmem [resolvable:$true] %s179_s11 }
 0x115   :  { %s298_s3 = scalar_lea.vmem %s168_s9, 128  ;;  %p303_p11 = scmp.lt.s32.totalorder %s168_s9, %s168_s9 }
 0x116   :  { %p299_p10 = scmp.ne.s32.totalorder %s168_s9, %s298_s3  ;;  %p304_p12 = scmp.lt.s32.totalorder %s298_s3, %s298_s3 }
 0x118   :  { %p305_p13 = por %p304_p12, %p303_p11 }
 0x11a   :  { %p306_p0 = pnand %p305_p13, %p299_p10 }
 0x17a   :  { %v143_v13 = vpop.permute.xlu1 %142  ;;  %v135_v14 = vpop.permute.xlu0 %134 }
 0x17b   :  { %148 = vst.msk [vmem:[#allocation10] sm:$0xf] %vm131_vm2, %v143_v13  ;;  %140 = vst.msk [vmem:[#allocation8] sm:$0xf] %vm131_vm2, %v135_v14 }
 0x185   :  { %v145_v15 = vpop.permute.xlu1 %144  ;;  %v137_v16 = vpop.permute.xlu0 %136 }
 0x186   :  { %149 = vst.msk [vmem:[#allocation10 + $0x4] sm:$0xf] %vm131_vm2, %v145_v15  ;;  %141 = vst.msk [vmem:[#allocation8 + $0x4] sm:$0xf] %vm131_vm2, %v137_v16 }
 0x187   :  { %309 = shalt.err (!%p306_p0)
}
 0x188   :  { %s310_s14 = scalar_lea.hbm %s487_s4, 128 }
 0x189   :  { %p311_p1 = scmp.ne.s32.totalorder %s487_s4, %s310_s14  ;;  %p314_p2 = scmp.lt.u32.totalorder %s310_s14, %s487_s4 }
 0x18b   :  { %p316_p3 = pnand %p314_p2, %p311_p1 }
 0x18d   :  { %319 = shalt.err (!%p316_p3)
}
 0x18e   :  { %173 = dma.vmem_to_hbm [thread:$0]  %s168_s9, 128, %s487_s4, [#allocation9], %s351_s28, %s351_s28, %s352_s29  }
 0x18f   :  { %s320_s1 = scalar_lea.vmem %s444_s11, 128  ;;  %p325_p5 = scmp.lt.s32.totalorder %s444_s11, %s444_s11 }
 0x190   :  { %p321_p4 = scmp.ne.s32.totalorder %s444_s11, %s320_s1  ;;  %p326_p6 = scmp.lt.s32.totalorder %s320_s1, %s320_s1 }
 0x192   :  { %p327_p7 = por %p326_p6, %p325_p5 }
 0x194   :  { %p328_p8 = pnand %p327_p7, %p321_p4 }
 0x196   :  { %331 = shalt.err (!%p328_p8)
}
 0x197   :  { %s332_s2 = scalar_lea.hbm %s488_s5, 128 }
 0x198   :  { %p333_p9 = scmp.ne.s32.totalorder %s488_s5, %s332_s2  ;;  %p336_p10 = scmp.lt.u32.totalorder %s332_s2, %s488_s5 }
 0x19a   :  { %p338_p11 = pnand %p336_p10, %p333_p9 }
 0x19c   :  { %341 = shalt.err (!%p338_p11)
}
 0x19d   :  { %185 = dma.vmem_to_hbm [thread:$0]  %s444_s11, 128, %s488_s5, [#allocation9], %s351_s28, %s351_s28, %s352_s29  }
 0x19e   :  { %346 = dma.done.wait [#allocation4], 128  }
 0x19f   :  { %347 = vsyncadd [#allocation4], 4294967168 }
 0x1a0   :  { %348 = dma.done.wait [#allocation9], 256  }
 0x1a1   :  { %349 = vsyncadd [#allocation9], 4294967040 }
 0x1a2   :  { %195 = vsyncpa [#allocation3], 1 }
 0x1a3   :  { %196 = vsyncpa [#allocation6], 1 }
 0x1a4   :  { %197 = vsyncpa [#allocation4], 1 }
 0x1a5   :  { %198 = vsyncpa [#allocation9], 1 }

// kernel: tpu_custom_call.1
= control target key start
LH: loop header
LB: loop body
LE: loop exit
PB: predicated region body
PF: predicated region fallthrough
CT: control target
= control target key end

     0   :  { %11 = vsyncpa [#allocation3], 0  ;;  %s483_s0 = inlined_call_operand.hbm [shape: bf16[16,32], index: 0, kind: input, shape index: {}]   ;;  %s484_s1 = inlined_call_operand.hbm [shape: bf16[32,96], index: 1, kind: input, shape index: {}]   ;;  %s485_s2 = inlined_call_operand.vmem [shape: f32[1,96], index: 2, kind: input, shape index: {}]   ;;  %s486_s3 = inlined_call_operand.hbm [shape: bf16[16,32], index: 3, kind: output, shape index: {0}]   ;;  %s487_s4 = inlined_call_operand.hbm [shape: bf16[16,32], index: 4, kind: output, shape index: {1}]   ;;  %s488_s5 = inlined_call_operand.hbm [shape: bf16[16,32], index: 5, kind: output, shape index: {2}]  }
   0x1   :  { %12 = vsyncpa [#allocation6], 0 }
   0x2   :  { %13 = vsyncpa [#allocation4], 0 }
   0x3   :  { %14 = vsyncpa [#allocation9], 0  ;;  %s350_s18 = smov [#allocation2]   ;;  %s232_s22 = scalar_lea.hbm %s483_s0, 128 }
   0x4   :  { %s20_s19 = sshll.u32 %s350_s18, 4  ;;  %p233_p0 = scmp.ne.s32.totalorder %s483_s0, %s232_s22  ;;  %s21_s19 = int_to_ptr.vmem [resolvable:$true] %s20_s19 }
   0x5   :  { %p236_p1 = scmp.lt.u32.totalorder %s232_s22, %s483_s0 }
   0x7   :  { %p238_p2 = pnand %p236_p1, %p233_p0 }
   0x9   :  { %241 = shalt.err (!%p238_p2)
}
   0xa   :  { %s242_s27 = scalar_lea.vmem %s21_s19, 128  ;;  %p247_p4 = scmp.lt.s32.totalorder %s21_s19, %s21_s19 }
   0xb   :  { %p243_p3 = scmp.ne.s32.totalorder %s21_s19, %s242_s27  ;;  %p248_p5 = scmp.lt.s32.totalorder %s242_s27, %s242_s27 }
   0xd   :  { %p249_p6 = por %p248_p5, %p247_p4 }
   0xf   :  { %p250_p7 = pnand %p249_p6, %p243_p3 }
  0x11   :  { %253 = shalt.err (!%p250_p7)
}
  0x12   :  { %s351_s28 = smov 64   ;;  %s352_s29 = smov 4  }
  0x13   :  { %26 = dma.hbm_to_vmem [thread:$0]  %s483_s0, 128, %s21_s19, [#allocation3], %s351_s28, %s351_s28, %s352_s29  }
  0x14   :  { %s353_s7 = smov [#allocation5]   ;;  %s254_s11 = scalar_lea.hbm %s484_s1, 256 }
  0x15   :  { %s32_s8 = sshll.u32 %s353_s7, 4  ;;  %p255_p8 = scmp.ne.s32.totalorder %s484_s1, %s254_s11  ;;  %s33_s8 = int_to_ptr.vmem [resolvable:$true] %s32_s8 }
  0x16   :  { %p258_p9 = scmp.lt.u32.totalorder %s254_s11, %s484_s1 }
  0x18   :  { %p260_p10 = pnand %p258_p9, %p255_p8 }
  0x1a   :  { %263 = shalt.err (!%p260_p10)
}
  0x1b   :  { %s264_s16 = scalar_lea.vmem %s33_s8, 256  ;;  %p269_p12 = scmp.lt.s32.totalorder %s33_s8, %s33_s8 }
  0x1c   :  { %p265_p11 = scmp.ne.s32.totalorder %s33_s8, %s264_s16  ;;  %p270_p13 = scmp.lt.s32.totalorder %s264_s16, %s264_s16 }
  0x1e   :  { %p271_p0 = por %p270_p13, %p269_p12 }
  0x20   :  { %p272_p1 = pnand %p271_p0, %p265_p11 }
  0x22   :  { %275 = shalt.err (!%p272_p1)
}
  0x23   :  { %38 = dma.hbm_to_vmem [thread:$0]  %s484_s1, 256, %s33_s8, [#allocation6], %s351_s28, %s351_s28, %s352_s29  }
  0x24   :  { %342 = dma.done.wait [#allocation3], 128  }
  0x25   :  { %343 = vsyncadd [#allocation3], 4294967168 }
  0x26   :  { %344 = dma.done.wait [#allocation6], 256  }
  0x27   :  { %345 = vsyncadd [#allocation6], 4294967040  ;;  %v354_v0 = vmov 0.0   ;;  %vm355_vm0 = vmmov 0   ;;  %v229_v1 = vld [vmem:[#allocation5] sm:$0xff]   ;;  %v230_v2 = vld [vmem:[#allocation5 + $0x8] sm:$0xff]  }
  0x28   :  { %211 = vmatprep.subr.bf16.mxu0 %v354_v0  ;;  %215 = vmatprep.mubr.msk.bf16.mxu0 %vm355_vm0, %v354_v0  ;;  %v231_v3 = vld [vmem:[#allocation2] sm:$0xff]   ;;  %vm78_vm1 = vcmask 261120   ;;  %vm131_vm2 = vcmask 257024   ;;  %s356_s1 = smov [#allocation7]   ;;  %s357_s21 = smov 96  }
  0x29   :  { %212 = vmatpush3.bf16.msra.mxu0 %v229_v1  ;;  %v199_v4 = vld [vmem:[%s485_s2] ss:$0 sm:$0xff]  ;;  %s155_s20 = sshll.u32 %s356_s1, 4  ;;  %s156_s20 = int_to_ptr.vmem [resolvable:$true] %s155_s20 }
  0x2a   :  { %213 = vmatprep.subr.bf16.mxu0 %v354_v0  ;;  %s276_s2 = scalar_lea.vmem %s156_s20, 128  ;;  %p281_p3 = scmp.lt.s32.totalorder %s156_s20, %s156_s20 }
  0x2b   :  { %p277_p2 = scmp.ne.s32.totalorder %s156_s20, %s276_s2  ;;  %p282_p4 = scmp.lt.s32.totalorder %s276_s2, %s276_s2 }
  0x2d   :  { %214 = vmatpush3.bf16.msra.mxu0 %v230_v2  ;;  %p283_p5 = por %p282_p4, %p281_p3 }
  0x2f   :  { %p284_p6 = pnand %p283_p5, %p277_p2 }
  0x30   :  { %216 = vmatmul.mubr.msk.bf16.vlgmr.msra.gmra.mrb[0].mxu0 %vm78_vm1, %v231_v3 }
 0x103   :  { %v116_v5 = vpop.f32.mrb[0].mxu0 }
 0x104   :  { %v117_v6 = vadd.f32 %v199_v4, %v116_v5  ;;  %v217_v7 = vpop.f32.mrb[1].mxu0 }
 0x105   :  { %v119_v8 = vpop.f32.mrb[2].mxu0 }
 0x106   :  { %v206_v9 = vpack.c.bf16 %v117_v6, %v117_v6  ;;  %v120_v10 = vadd.f32 %v199_v4, %v119_v8  ;;  %v218_v11 = vpop.f32.mrb[3].mxu0 }
 0x108   :  { %v207_v12 = vpack.c.bf16 %v120_v10, %v120_v10  ;;  %142 = vrot.lane.b32.xlu1 %v206_v9, %s351_s28  ;;  %134 = vrot.lane.b32.xlu0 %v206_v9, %s357_s21  ;;  %132 = vst.msk [vmem:[#allocation7] sm:$0xf] %vm131_vm2, %v206_v9 }
 0x10a   :  { %133 = vst.msk [vmem:[#allocation7 + $0x4] sm:$0xf] %vm131_vm2, %v207_v12 }
 0x10b   :  { %287 = shalt.err (!%p284_p6)
}
 0x10c   :  { %s288_s24 = scalar_lea.hbm %s486_s3, 128 }
 0x10d   :  { %p289_p7 = scmp.ne.s32.totalorder %s486_s3, %s288_s24  ;;  %p292_p8 = scmp.lt.u32.totalorder %s288_s24, %s486_s3 }
 0x10f   :  { %p294_p9 = pnand %p292_p8, %p289_p7 }
 0x111   :  { %297 = shalt.err (!%p294_p9)
}
 0x112   :  { %161 = dma.vmem_to_hbm [thread:$0]  %s156_s20, 128, %s486_s3, [#allocation4], %s351_s28, %s351_s28, %s352_s29  }
 0x113   :  { %144 = vrot.lane.b32.xlu1 %v207_v12, %s351_s28  ;;  %136 = vrot.lane.b32.xlu0 %v207_v12, %s357_s21  ;;  %s358_s8 = smov [#allocation8]   ;;  %s359_s10 = smov [#allocation10]  }
 0x114   :  { %s167_s9 = sshll.u32 %s358_s8, 4  ;;  %s179_s11 = sshll.u32 %s359_s10, 4  ;;  %s168_s9 = int_to_ptr.vmem [resolvable:$true] %s167_s9  ;;  %s444_s11 = int_to_ptr.vmem [resolvable:$true] %s179_s11 }
 0x115   :  { %s298_s3 = scalar_lea.vmem %s168_s9, 128  ;;  %p303_p11 = scmp.lt.s32.totalorder %s168_s9, %s168_s9 }
 0x116   :  { %p299_p10 = scmp.ne.s32.totalorder %s168_s9, %s298_s3  ;;  %p304_p12 = scmp.lt.s32.totalorder %s298_s3, %s298_s3 }
 0x118   :  { %p305_p13 = por %p304_p12, %p303_p11 }
 0x11a   :  { %p306_p0 = pnand %p305_p13, %p299_p10 }
 0x17a   :  { %v143_v13 = vpop.permute.xlu1 %142  ;;  %v135_v14 = vpop.permute.xlu0 %134 }
 0x17b   :  { %148 = vst.msk [vmem:[#allocation10] sm:$0xf] %vm131_vm2, %v143_v13  ;;  %140 = vst.msk [vmem:[#allocation8] sm:$0xf] %vm131_vm2, %v135_v14 }
 0x185   :  { %v145_v15 = vpop.permute.xlu1 %144  ;;  %v137_v16 = vpop.permute.xlu0 %136 }
 0x186   :  { %149 = vst.msk [vmem:[#allocation10 + $0x4] sm:$0xf] %vm131_vm2, %v145_v15  ;;  %141 = vst.msk [vmem:[#allocation8 + $0x4] sm:$0xf] %vm131_vm2, %v137_v16 }
 0x187   :  { %309 = shalt.err (!%p306_p0)
}
 0x188   :  { %s310_s14 = scalar_lea.hbm %s487_s4, 128 }
 0x189   :  { %p311_p1 = scmp.ne.s32.totalorder %s487_s4, %s310_s14  ;;  %p314_p2 = scmp.lt.u32.totalorder %s310_s14, %s487_s4 }
 0x18b   :  { %p316_p3 = pnand %p314_p2, %p311_p1 }
 0x18d   :  { %319 = shalt.err (!%p316_p3)
}
 0x18e   :  { %173 = dma.vmem_to_hbm [thread:$0]  %s168_s9, 128, %s487_s4, [#allocation9], %s351_s28, %s351_s28, %s352_s29  }
 0x18f   :  { %s320_s1 = scalar_lea.vmem %s444_s11, 128  ;;  %p325_p5 = scmp.lt.s32.totalorder %s444_s11, %s444_s11 }
 0x190   :  { %p321_p4 = scmp.ne.s32.totalorder %s444_s11, %s320_s1  ;;  %p326_p6 = scmp.lt.s32.totalorder %s320_s1, %s320_s1 }
 0x192   :  { %p327_p7 = por %p326_p6, %p325_p5 }
 0x194   :  { %p328_p8 = pnand %p327_p7, %p321_p4 }
 0x196   :  { %331 = shalt.err (!%p328_p8)
}
 0x197   :  { %s332_s2 = scalar_lea.hbm %s488_s5, 128 }
 0x198   :  { %p333_p9 = scmp.ne.s32.totalorder %s488_s5, %s332_s2  ;;  %p336_p10 = scmp.lt.u32.totalorder %s332_s2, %s488_s5 }
 0x19a   :  { %p338_p11 = pnand %p336_p10, %p333_p9 }
 0x19c   :  { %341 = shalt.err (!%p338_p11)
}
 0x19d   :  { %185 = dma.vmem_to_hbm [thread:$0]  %s444_s11, 128, %s488_s5, [#allocation9], %s351_s28, %s351_s28, %s352_s29  }
 0x19e   :  { %346 = dma.done.wait [#allocation4], 128  }
 0x19f   :  { %347 = vsyncadd [#allocation4], 4294967168 }
 0x1a0   :  { %348 = dma.done.wait [#allocation9], 256  }
 0x1a1   :  { %349 = vsyncadd [#allocation9], 4294967040 }
 0x1a2   :  { %195 = vsyncpa [#allocation3], 1 }
 0x1a3   :  { %196 = vsyncpa [#allocation6], 1 }
 0x1a4   :  { %197 = vsyncpa [#allocation4], 1 }
 0x1a5   :  { %198 = vsyncpa [#allocation9], 1 }

</bundles_post_ra>
